<compile_context>
chip_gen: v6e
topology: v6e:2x2x1
jax: 0.10.0
libtpu: 0.0.40
codegen_flags: <defaults>
</compile_context>

<pallas_src>
import functools

import jax
import jax.numpy as jnp
from jax.experimental import pallas as pl
from jax.experimental.pallas import tpu as pltpu


def _critic_kernel(state_ref, w1_ref, aux_ref, b2_ref, out_ref, *, mxu_bf16):
    """Fused Critic forward for one batch tile.

    state_ref : [TB, obs_dim]    (VMEM)
    w1_ref    : [obs_dim, H]     (VMEM, resident across grid steps)
    aux_ref   : [2, H]           (VMEM; row 0 = b1, row 1 = w2[:, 0])
    b2_ref    : [1]              (SMEM scalar)
    out_ref   : [1, TB]          (VMEM, lane-dense: batch on the lane axis)
    """
    x = state_ref[...]
    w1 = w1_ref[...]
    if mxu_bf16:
        # bf16 MXU inputs, f32 accumulation (native rate on v6e / v7x).
        x = x.astype(jnp.bfloat16)
        w1 = w1.astype(jnp.bfloat16)

    # Layer 1 on the MXU, f32 accumulation; bias + ReLU on the VPU.
    h = jnp.dot(x, w1, preferred_element_type=jnp.float32)        # [TB, H]
    h = jnp.maximum(h + aux_ref[0:1, :], 0.0)

    # Layer 2: output width 1 -> skip the MXU.  VPU multiply + lane reduction.
    v = jnp.sum(h * aux_ref[1:2, :], axis=-1)                     # [TB]
    v = v + b2_ref[0]                                             # scalar bias (SMEM)

    # Lane-dense store: batch sits on the lane axis.
    out_ref[...] = v[None, :].astype(out_ref.dtype)               # [1, TB]


def critic_forward(state, w1, b1, w2, b2, *, block_b=512, mxu_bf16=False):
    """value = relu(state @ w1 + b1) @ w2 + b2, returned as [B, 1]."""
    assert block_b % 128 == 0, "batch tile must be lane-aligned (multiple of 128)"
    B, obs_dim = state.shape
    hidden_dim = w1.shape[1]

    # Pack the tiny parameters: b1 and the single w2 column share one VMEM tile,
    # b2 rides in SMEM -> no separately padded / double-buffered bias tiles.
    aux = jnp.stack([b1, w2[:, 0]], axis=0).astype(jnp.float32)   # [2, H]
    b2_s = b2.reshape(1).astype(jnp.float32)                      # [1] scalar (SMEM)

    # Pick the batch tile.  Small B: one tile, no grid.  Large B: multiples of
    # 128 so the (1, TB) output block is an unmasked lane-dense store.
    if B <= block_b:
        tb = max(8, ((B + 7) // 8) * 8)       # sublane-aligned single tile
        b_pad = tb
    else:
        tb = block_b
        b_pad = pl.cdiv(B, tb) * tb
    num_tiles = b_pad // tb

    state_p = state if b_pad == B else jnp.pad(state, ((0, b_pad - B), (0, 0)))

    kernel = functools.partial(_critic_kernel, mxu_bf16=mxu_bf16)
    out_shape = jax.ShapeDtypeStruct((1, b_pad), state.dtype)

    if num_tiles == 1:
        # Toy / small-batch path: grid-less call, everything fits one tile.
        out = pl.pallas_call(
            kernel,
            out_shape=out_shape,
            in_specs=[
                pl.BlockSpec(memory_space=pltpu.MemorySpace.VMEM),   # state
                pl.BlockSpec(memory_space=pltpu.MemorySpace.VMEM),   # w1
                pl.BlockSpec(memory_space=pltpu.MemorySpace.VMEM),   # [b1; w2]
                pl.BlockSpec(memory_space=pltpu.MemorySpace.SMEM),   # b2 scalar
            ],
            out_specs=pl.BlockSpec(memory_space=pltpu.MemorySpace.VMEM),
        )(state_p, w1, aux, b2_s)
    else:
        # Batch-tiled path: state-tile DMA for step i+1 overlaps compute of
        # step i; weights stay VMEM-resident (constant index_map); the batch
        # axis is "parallel" so v7x can shard it across its two TensorCores.
        out = pl.pallas_call(
            kernel,
            out_shape=out_shape,
            grid=(num_tiles,),
            in_specs=[
                pl.BlockSpec((tb, obs_dim), lambda i: (i, 0)),             # state tile
                pl.BlockSpec((obs_dim, hidden_dim), lambda i: (0, 0)),     # w1 resident
                pl.BlockSpec((2, hidden_dim), lambda i: (0, 0)),           # aux resident
                pl.BlockSpec(memory_space=pltpu.MemorySpace.SMEM),         # b2 scalar
            ],
            out_specs=pl.BlockSpec((1, tb), lambda i: (0, i)),             # lane-dense
            compiler_params=pltpu.CompilerParams(
                dimension_semantics=("parallel",),
            ),
        )(state_p, w1, aux, b2_s)

    return out[0, :B].reshape(B, 1)


def init_params(key, obs_dim, hidden_dim):
    # Deterministic init mimicking PyTorch's default Linear init
    # (uniform in [-1/sqrt(fan_in), 1/sqrt(fan_in)]).
    k1, k2, k3, k4 = jax.random.split(key, 4)
    bound1 = 1.0 / jnp.sqrt(obs_dim)
    bound2 = 1.0 / jnp.sqrt(hidden_dim)
    w1 = jax.random.uniform(k1, (obs_dim, hidden_dim), jnp.float32, -bound1, bound1)
    b1 = jax.random.uniform(k2, (hidden_dim,), jnp.float32, -bound1, bound1)
    w2 = jax.random.uniform(k3, (hidden_dim, 1), jnp.float32, -bound2, bound2)
    b2 = jax.random.uniform(k4, (1,), jnp.float32, -bound2, bound2)
    return w1, b1, w2, b2


if __name__ == "__main__":
    key = jax.random.PRNGKey(0)
    k_state, k_params, k_state2 = jax.random.split(key, 3)

    # Small shapes consistent with the module: batch=8, obs_dim=16, hidden=32.
    B, obs_dim, hidden_dim = 8, 16, 32
    state = jax.random.normal(k_state, (B, obs_dim), jnp.float32)
    w1, b1, w2, b2 = init_params(k_params, obs_dim, hidden_dim)

    # Grid-less toy path.
    value = jax.block_until_ready(critic_forward(state, w1, b1, w2, b2))
    ref = jnp.maximum(state @ w1 + b1, 0.0) @ w2 + b2
    assert value.shape == (B, 1)
    assert jnp.allclose(value, ref, atol=1e-5, rtol=1e-5)

    # Batch-tiled path (grid over batch, lane-dense output, resident weights).
    B2 = 1000
    state2 = jax.random.normal(k_state2, (B2, obs_dim), jnp.float32)
    value2 = jax.block_until_ready(
        critic_forward(state2, w1, b1, w2, b2, block_b=512))
    ref2 = jnp.maximum(state2 @ w1 + b1, 0.0) @ w2 + b2
    assert value2.shape == (B2, 1)
    assert jnp.allclose(value2, ref2, atol=1e-4, rtol=1e-4)

    print("KERNEL_OK")
</pallas_src>

<mosaic_0001>
module attributes {stable_mosaic.version = 11 : i64} {
  func.func @_critic_kernel(%arg0: memref<8x16xf32, #tpu.memory_space<vmem>>, %arg1: memref<16x32xf32, #tpu.memory_space<vmem>>, %arg2: memref<2x32xf32, #tpu.memory_space<vmem>>, %arg3: memref<1xf32, #tpu.memory_space<smem>>, %arg4: memref<1x8xf32, #tpu.memory_space<vmem>>) attributes {dimension_semantics = [], scalar_prefetch = 0 : i64, scratch_operands = 0 : i64, tpu.core_type = #tpu.core_type<tc>} {
    %c0 = arith.constant 0 : index
    %c0_0 = arith.constant 0 : index
    %0 = vector.load %arg0[%c0, %c0_0] : memref<8x16xf32, #tpu.memory_space<vmem>>, vector<8x16xf32>
    %c0_1 = arith.constant 0 : index
    %c0_2 = arith.constant 0 : index
    %1 = vector.load %arg1[%c0_1, %c0_2] : memref<16x32xf32, #tpu.memory_space<vmem>>, vector<16x32xf32>
    %cst = arith.constant dense<0.000000e+00> : vector<8x32xf32>
    %2 = tpu.matmul %0, %1, %cst {dimension_numbers = #tpu.dot_dimension_numbers<[1], [0], [0], [1], [0, 0, 1, 1], [], []>} : vector<8x16xf32>, vector<16x32xf32>, vector<8x32xf32> -> vector<8x32xf32>
    %c0_3 = arith.constant 0 : index
    %c0_4 = arith.constant 0 : index
    %3 = vector.load %arg2[%c0_3, %c0_4] : memref<2x32xf32, #tpu.memory_space<vmem>>, vector<1x32xf32>
    %4 = vector.broadcast %3 : vector<1x32xf32> to vector<8x32xf32>
    %5 = arith.addf %2, %4 : vector<8x32xf32>
    %cst_5 = arith.constant 0.000000e+00 : f32
    %6 = vector.broadcast %cst_5 : f32 to vector<8x32xf32>
    %7 = arith.maximumf %5, %6 : vector<8x32xf32>
    %c1 = arith.constant 1 : index
    %c0_6 = arith.constant 0 : index
    %8 = vector.load %arg2[%c1, %c0_6] : memref<2x32xf32, #tpu.memory_space<vmem>>, vector<1x32xf32>
    %9 = vector.broadcast %8 : vector<1x32xf32> to vector<8x32xf32>
    %10 = arith.mulf %7, %9 : vector<8x32xf32>
    %cst_7 = arith.constant dense<0.000000e+00> : vector<8xf32>
    %11 = vector.multi_reduction <add>, %10, %cst_7 [1] : vector<8x32xf32> to vector<8xf32>
    %c0_8 = arith.constant 0 : index
    %12 = memref.load %arg3[%c0_8] : memref<1xf32, #tpu.memory_space<smem>>
    %13 = vector.broadcast %12 : f32 to vector<8xf32>
    %14 = arith.addf %11, %13 : vector<8xf32>
    %15 = vector.shape_cast %14 : vector<8xf32> to vector<1x8xf32>
    %c0_9 = arith.constant 0 : index
    %c0_10 = arith.constant 0 : index
    %16 = vector.load %arg4[%c0_9, %c0_10] : memref<1x8xf32, #tpu.memory_space<vmem>>, vector<1x8xf32>
    tpu.vector_store %arg4[%c0_9, %c0_10], %15 {strides = array<i32>} : memref<1x8xf32, #tpu.memory_space<vmem>>, vector<1x8xf32>,
    return
  }
}

</mosaic_0001>

<bundles_post_ra>
// kernel: tpu_custom_call.1
= control target key start
LH: loop header
LB: loop body
LE: loop exit
PB: predicated region body
PF: predicated region fallthrough
CT: control target
= control target key end

     0   :  { %10 = vsyncpa [#allocation4], 0  ;;  %s303_s0 = inlined_call_operand.hbm [shape: f32[8,16], index: 0, kind: input, shape index: {}]   ;;  %s304_s1 = inlined_call_operand.hbm [shape: f32[16,32], index: 1, kind: input, shape index: {}]   ;;  %s305_s2 = inlined_call_operand.vmem [shape: f32[2,32], index: 2, kind: input, shape index: {}]   ;;  %s306_s3 = inlined_call_operand.<no memory space> [shape: f32[1], index: 3, kind: input, shape index: {}]   ;;  %s307_s4 = inlined_call_operand.hbm [shape: f32[1,8], index: 4, kind: output, shape index: {}]  }
   0x1   :  { %11 = vsyncpa [#allocation7], 0 }
   0x2   :  { %12 = vsyncpa [#allocation5], 0  ;;  %s253_s15 = smov [#allocation3]   ;;  %s254_s17 = smov [#allocation6]  }
   0x3   :  { %s19_s16 = sshll.u32 %s253_s15, 4  ;;  %s28_s18 = sshll.u32 %s254_s17, 4  ;;  %s20_s16 = int_to_ptr.vmem [resolvable:$true] %s19_s16  ;;  %s29_s18 = int_to_ptr.vmem [resolvable:$true] %s28_s18 }
   0x4   :  { %s195_s19 = scalar_lea.vmem %s20_s16, 128  ;;  %p200_p1 = scmp.lt.s32.totalorder %s20_s16, %s20_s16 }
   0x5   :  { %p196_p0 = scmp.ne.s32.totalorder %s20_s16, %s195_s19  ;;  %p201_p2 = scmp.lt.s32.totalorder %s195_s19, %s195_s19 }
   0x7   :  { %p202_p3 = por %p201_p2, %p200_p1 }
   0x9   :  { %p203_p4 = pnand %p202_p3, %p196_p0 }
   0xb   :  { %206 = shalt.err (!%p203_p4)
}
   0xc   :  { %22 = dma.hbm_to_vmem [thread:$0]  %s303_s0, 128, %s20_s16, [#allocation4]  }
   0xd   :  { %s215_s22 = scalar_lea.vmem %s29_s18, 256  ;;  %p220_p6 = scmp.lt.s32.totalorder %s29_s18, %s29_s18 }
   0xe   :  { %p216_p5 = scmp.ne.s32.totalorder %s29_s18, %s215_s22  ;;  %p221_p7 = scmp.lt.s32.totalorder %s215_s22, %s215_s22 }
  0x10   :  { %p222_p8 = por %p221_p7, %p220_p6 }
  0x12   :  { %p223_p9 = pnand %p222_p8, %p216_p5 }
  0x14   :  { %226 = shalt.err (!%p223_p9)
}
  0x15   :  { %s255_s23 = smov 128   ;;  %s256_s24 = smov 8  }
  0x16   :  { %34 = dma.hbm_to_vmem [thread:$0]  %s304_s1, 256, %s29_s18, [#allocation7], %s255_s23, %s255_s23, %s256_s24  }
  0x17   :  { %247 = dma.done.wait [#allocation4], 128  }
  0x18   :  { %248 = vsyncadd [#allocation4], 4294967168 }
  0x19   :  { %249 = dma.done.wait [#allocation7], 256  }
  0x1a   :  { %250 = vsyncadd [#allocation7], 4294967040  ;;  %v257_v0 = vmov 0.0   ;;  %vm258_vm0 = vmmov 0   ;;  %v47_v1 = vld [vmem:[#allocation6 + $0x8] sm:$0xff]  ;;  %v46_v2 = vld [vmem:[#allocation6] sm:$0xff]  ;;  %v142_v12 = vlaneseq  ;;  %v139_v15 = vstv %s306_s3 }
  0x1b   :  { %173 = vmatprep.subr.mxu0 %v257_v0  ;;  %177 = vmatprep.mubr.msk.f32.mxu0 %vm258_vm0, %v257_v0  ;;  %v45_v3 = vld [vmem:[#allocation3] sm:$0xff]  ;;  %vm53_vm1 = vcmask 130048   ;;  %vm134_vm2 = vcmask 261120   ;;  %s259_s5 = smov [#allocation8]   ;;  %vm149_vm3 = vcmask 57344  }
  0x1c   :  { %174 = vmatpush3.msra.mxu0 %v47_v1  ;;  %v167_v4 = vld [vmem:[%s305_s2] ss:$0 sm:$0xff]  ;;  %v169_v8 = vld [vmem:[%s305_s2 + $0x1] ss:$0 sm:$0xff]  ;;  %v143_v13 = vand.u32 127, %v142_v12  ;;  %v145_v14 = vshrl.u32 %v142_v12, 7 }
  0x1d   :  { %175 = vmatprep.subr.mxu0 %v257_v0  ;;  %s157_s6 = sshll.u32 %s259_s5, 4  ;;  %s158_s6 = int_to_ptr.vmem [resolvable:$true] %s157_s6 }
  0x1e   :  { %176 = vmatpush3.msra.mxu0 %v46_v2  ;;  %v146_v16 = vsub.s32 %v143_v13, %v145_v14  ;;  %s227_s2 = scalar_lea.vmem %s158_s6, 16  ;;  %s231_s7 = scalar_lea.vmem %s158_s6, 32 }
  0x1f   :  { %178 = vmatmul.mubr.msk.f32.vlgmr.msra.gmra.mxu0 %vm53_vm1, %v45_v3  ;;  %p228_p10 = scmp.ne.s32.totalorder %s158_s6, %s227_s2  ;;  %p232_p11 = scmp.lt.s32.totalorder %s158_s6, %s158_s6 }
  0x20   :  { %p233_p12 = scmp.lt.s32.totalorder %s231_s7, %s227_s2 }
  0x22   :  { %p234_p13 = por %p233_p12, %p232_p11 }
  0x24   :  { %p235_p0 = pnand %p234_p13, %p228_p10 }
  0xdf   :  { %v123_v5 = vpop.f32.mrf.mxu0 }
  0xe0   :  { %v124_v6 = vadd.f32 %v167_v4, %v123_v5 }
  0xe1   :  { %v179_v7 = vpop.f32.mrf.mxu0 }
  0xe2   :  { %v127_v9 = vmax.f32 %v124_v6, 0.0 }
  0xe4   :  { %v133_v10 = vmul.f32 %v169_v8, %v127_v9 }
  0xe6   :  { %v135_v11 = vsel %vm134_vm2, %v133_v10, 0.0 }
  0xe7   :  { %136 = vadd.xlane.f32.xlu0 %v135_v11 }
 0x170   :  { %v137_v17 = vpop.xlane.xlu0 %136 }
 0x171   :  { %v140_v18 = vadd.f32 %v139_v15, %v137_v17 }
 0x173   :  { %v147_v19 = vrot.slane %v140_v18, %v146_v16 }
 0x175   :  { %150 = vst.msk [vmem:[#allocation8] sm:$0x1] %vm149_vm3, %v147_v19 }
 0x176   :  { %238 = shalt.err (!%p235_p0)
}
 0x177   :  { %160 = dma.vmem_to_hbm [thread:$0]  %s158_s6, 16, %s307_s4, [#allocation5]  }
 0x178   :  { %251 = dma.done.wait [#allocation5], 16  }
 0x179   :  { %252 = vsyncadd [#allocation5], 4294967280 }
 0x17a   :  { %164 = vsyncpa [#allocation4], 1 }
 0x17b   :  { %165 = vsyncpa [#allocation7], 1 }
 0x17c   :  { %166 = vsyncpa [#allocation5], 1 }

</bundles_post_ra>
